<compile_context>
chip_gen: v6e
topology: v6e:2x2x1
jax: 0.10.0
libtpu: 0.0.40
codegen_flags: <defaults>
</compile_context>

<pallas_src>
import jax
import jax.numpy as jnp
from jax.experimental import pallas as pl
from jax.experimental.pallas import tpu as pltpu


def _round_up(v, m):
    return (v + m - 1) // m * m


def _vmem_capacity_bytes():
    try:
        return int(pltpu.get_tpu_info().vmem_capacity_bytes)
    except Exception:
        # Conservative fallback: assume the smallest (v7x-style 64 MiB) VMEM.
        return 64 * 1024 * 1024


def _patch_embed_matmul_kernel(p_ref, w_ref, b_ref, o_ref):
    # p_ref: (tm, Kp) patch tile, w_ref: (Kp, Np) resident weight,
    # b_ref: (1, Np) f32 bias, o_ref: (tm, Np) output tile.
    acc = jnp.dot(p_ref[...], w_ref[...], preferred_element_type=jnp.float32)
    o_ref[...] = (acc + b_ref[...]).astype(o_ref.dtype)


def patch_embedding(x, weight, bias, patch_dim, image_dim,
                    *, matmul_dtype=jnp.bfloat16):
    """Forward pass of the PyTorch PatchEmbedding module.

    x:      (B, C, H, W)            NCHW, matching PyTorch Conv2d input.
    weight: (embed_dim, C, ph, pw)  PyTorch OIHW conv weight.
    bias:   (embed_dim,)
    Returns (B, num_patches, embed_dim) with dtype == x.dtype.
    """
    B, C, H, W = x.shape
    ph, pw = patch_dim
    assert (H, W) == tuple(image_dim), (
        "padding is derived from image_dim; it must match the actual input")

    # Same padding formula as the module; nn.Conv2d pads symmetrically.
    pad_x = (ph - image_dim[0] % ph) % ph
    pad_y = (pw - image_dim[1] % pw) % pw

    out_dtype = x.dtype

    # Cast BEFORE the unfold glue: the pad/reshape/transpose below are full
    # HBM passes over B*C*H*W, so do them at matmul precision (bf16 default).
    xm = x.astype(matmul_dtype)
    if pad_x or pad_y:
        xm = jnp.pad(xm, ((0, 0), (0, 0), (pad_x, pad_x), (pad_y, pad_y)))
    Hp, Wp = xm.shape[2], xm.shape[3]
    nH = (Hp - ph) // ph + 1
    nW = (Wp - pw) // pw + 1

    # Unfold: non-overlapping patches -> (M, K), M = B*nH*nW, K = C*ph*pw.
    patches = xm[:, :, : nH * ph, : nW * pw]
    patches = patches.reshape(B, C, nH, ph, nW, pw)
    patches = patches.transpose(0, 2, 4, 1, 3, 5)        # (B, nH, nW, C, ph, pw)
    patches = patches.reshape(B * nH * nW, C * ph * pw)  # (M, K)

    embed_dim = weight.shape[0]
    w2d = weight.reshape(embed_dim, -1).T.astype(matmul_dtype)  # (K, N)
    b2d = bias.reshape(1, embed_dim).astype(jnp.float32)        # (1, N)

    M, K = patches.shape
    N = embed_dim

    # --- MXU / vreg friendly padded sizes (lane-dense, no masked stores) ----
    Kp = _round_up(K, 128)
    Np = _round_up(N, 128)   # tn == Np: whole weight resident, single N tile.

    vmem_cap = _vmem_capacity_bytes()
    small_vmem = vmem_cap <= 64 * 1024 * 1024        # v7x-class chips
    tm_cap = 512 if small_vmem else 1024             # v5e/v6e: 128 MiB VMEM

    # tm from {128, 256, 512, 1024}: biggest MXU-aligned tile <= cap and <= M.
    m_rounded = max(128, _round_up(M, 128))
    tm = 128
    for cand in (256, 512, 1024):
        if cand <= tm_cap and cand <= m_rounded:
            tm = cand
    # Prefer >= 2 M-tiles so both v7x TensorCores get work (megacore).
    if pl.cdiv(M, tm) == 1 and tm > 128 and M > 128:
        tm = max(128, tm // 2)
    Mp = _round_up(M, tm)
    grid = (Mp // tm,)

    in_bytes = jnp.dtype(matmul_dtype).itemsize
    out_bytes = jnp.dtype(out_dtype).itemsize
    # Double-buffered footprint of one grid step (weight/bias DMA'd once but
    # still allocated double-buffered) + output tile.
    vmem_need = (2 * tm * Kp * in_bytes
                 + 2 * Kp * Np * in_bytes
                 + 2 * Np * 4
                 + 2 * tm * Np * out_bytes)
    vmem_ceiling = (40 if small_vmem else 96) * 1024 * 1024
    vmem_limit = int(min(max(2 * vmem_need, 16 * 1024 * 1024), vmem_ceiling))

    patches_p = patches
    if Mp != M or Kp != K:
        patches_p = jnp.pad(patches, ((0, Mp - M), (0, Kp - K)))
    w_p = w2d
    if Kp != K or Np != N:
        w_p = jnp.pad(w2d, ((0, Kp - K), (0, Np - N)))
    b_p = b2d
    if Np != N:
        b_p = jnp.pad(b2d, ((0, 0), (0, Np - N)))

    cost = pl.CostEstimate(
        flops=2 * M * K * N,
        transcendentals=0,
        bytes_accessed=(M * K + K * N) * in_bytes + N * 4 + M * N * out_bytes,
    )

    out = pl.pallas_call(
        _patch_embed_matmul_kernel,
        out_shape=jax.ShapeDtypeStruct((Mp, Np), out_dtype),
        grid=grid,
        in_specs=[
            pl.BlockSpec((tm, Kp), lambda i: (i, 0)),   # patches: streamed
            pl.BlockSpec((Kp, Np), lambda i: (0, 0)),   # weight: resident
            pl.BlockSpec((1, Np), lambda i: (0, 0)),    # bias:   resident
        ],
        out_specs=pl.BlockSpec((tm, Np), lambda i: (i, 0)),
        compiler_params=pltpu.CompilerParams(
            dimension_semantics=("parallel",),
            vmem_limit_bytes=vmem_limit,
        ),
        cost_estimate=cost,
    )(patches_p, w_p, b_p)

    # flatten(-2) + transpose(-2, -1) == (B, nH*nW, embed_dim); slice only if
    # padding was actually added (avoids an extra HBM pass otherwise).
    if Mp != M or Np != N:
        out = out[:M, :N]
    return out.reshape(B, nH * nW, N)


def _reference(x, weight, bias, patch_dim, image_dim):
    # Pure-JAX reference of the same math (unfold + einsum) for a sanity check.
    B, C, H, W = x.shape
    ph, pw = patch_dim
    pad_x = (ph - image_dim[0] % ph) % ph
    pad_y = (pw - image_dim[1] % pw) % pw
    xp = jnp.pad(x, ((0, 0), (0, 0), (pad_x, pad_x), (pad_y, pad_y)))
    nH = (xp.shape[2] - ph) // ph + 1
    nW = (xp.shape[3] - pw) // pw + 1
    p = xp[:, :, : nH * ph, : nW * pw].reshape(B, C, nH, ph, nW, pw)
    p = p.transpose(0, 2, 4, 1, 3, 5).reshape(B, nH * nW, C * ph * pw)
    w2d = weight.reshape(weight.shape[0], -1)
    return jnp.einsum("bpk,ek->bpe", p, w2d) + bias[None, None, :]


if __name__ == "__main__":
    # Small shapes consistent with the module: image 16x16, patch 4x4,
    # in_channels=4, embed_dim=32, batch=2  -> 16 patches per image.
    image_dim = (16, 16)
    patch_dim = (4, 4)
    in_channels = 4
    embed_dim = 32
    batch = 2

    key = jax.random.PRNGKey(0)
    kx, kw, kb = jax.random.split(key, 3)
    x = jax.random.normal(kx, (batch, in_channels, *image_dim), dtype=jnp.float32)
    # Deterministic, Conv2d-shaped parameters (OIHW weight, bias of size embed_dim).
    fan_in = in_channels * patch_dim[0] * patch_dim[1]
    bound = 1.0 / (fan_in ** 0.5)
    weight = jax.random.uniform(
        kw, (embed_dim, in_channels, *patch_dim), jnp.float32, -bound, bound)
    bias = jax.random.uniform(kb, (embed_dim,), jnp.float32, -bound, bound)

    ref = _reference(x, weight, bias, patch_dim, image_dim)

    # Default path: bf16 MXU inputs, f32 accumulation (fast on all generations).
    out = patch_embedding(x, weight, bias, patch_dim, image_dim)
    out = jax.block_until_ready(out)
    assert out.shape == (batch, 16, embed_dim), out.shape
    assert out.dtype == x.dtype, out.dtype
    assert jnp.allclose(out, ref, atol=2e-2, rtol=2e-2)

    # Optional f32-input path (kept for accuracy-sensitive use; slower on MXU).
    out_f32 = jax.block_until_ready(
        patch_embedding(x, weight, bias, patch_dim, image_dim,
                        matmul_dtype=jnp.float32))
    assert jnp.allclose(out_f32, ref, atol=1e-4, rtol=1e-4)

    print("KERNEL_OK")
</pallas_src>

<mosaic_0001>
module attributes {stable_mosaic.version = 11 : i64} {
  func.func @_patch_embed_matmul_kernel(%arg0: i32, %arg1: memref<128x128xbf16, #tpu.memory_space<vmem>>, %arg2: memref<128x128xbf16, #tpu.memory_space<vmem>>, %arg3: memref<1x128xf32, #tpu.memory_space<vmem>>, %arg4: memref<128x128xf32, #tpu.memory_space<vmem>>) attributes {dimension_semantics = [#tpu.dimension_semantics<parallel>], iteration_bounds = array<i64: 1>, scalar_prefetch = 0 : i64, scratch_operands = 0 : i64, tpu.core_type = #tpu.core_type<tc>, window_params = [{transform_indices = @transform_0, window_bounds = array<i64: 128, 128>}, {pipeline_mode = #tpu.pipeline_mode<synchronous>, transform_indices = @transform_1, window_bounds = array<i64: 128, 128>}, {pipeline_mode = #tpu.pipeline_mode<synchronous>, transform_indices = @transform_2, window_bounds = array<i64: 1, 128>}, {transform_indices = @transform_3, window_bounds = array<i64: 128, 128>}]} {
    %c0 = arith.constant 0 : index
    %c0_0 = arith.constant 0 : index
    %0 = vector.load %arg1[%c0, %c0_0] : memref<128x128xbf16, #tpu.memory_space<vmem>>, vector<128x128xbf16>
    %c0_1 = arith.constant 0 : index
    %c0_2 = arith.constant 0 : index
    %1 = vector.load %arg2[%c0_1, %c0_2] : memref<128x128xbf16, #tpu.memory_space<vmem>>, vector<128x128xbf16>
    %cst = arith.constant dense<0.000000e+00> : vector<128x128xf32>
    %2 = tpu.matmul %0, %1, %cst {dimension_numbers = #tpu.dot_dimension_numbers<[1], [0], [0], [1], [0, 0, 1, 1], [], []>} : vector<128x128xbf16>, vector<128x128xbf16>, vector<128x128xf32> -> vector<128x128xf32>
    %c0_3 = arith.constant 0 : index
    %c0_4 = arith.constant 0 : index
    %3 = vector.load %arg3[%c0_3, %c0_4] : memref<1x128xf32, #tpu.memory_space<vmem>>, vector<1x128xf32>
    %4 = vector.broadcast %3 : vector<1x128xf32> to vector<128x128xf32>
    %5 = arith.addf %2, %4 : vector<128x128xf32>
    %c0_5 = arith.constant 0 : index
    %c0_6 = arith.constant 0 : index
    %6 = vector.load %arg4[%c0_5, %c0_6] : memref<128x128xf32, #tpu.memory_space<vmem>>, vector<128x128xf32>
    tpu.vector_store %arg4[%c0_5, %c0_6], %5 {strides = array<i32>} : memref<128x128xf32, #tpu.memory_space<vmem>>, vector<128x128xf32>,
    return
  }
  func.func @transform_0(%arg0: i32) -> (i32, i32) {
    %c0_i32 = arith.constant 0 : i32
    %c0_i32_0 = arith.constant 0 : i32
    return %arg0, %c0_i32 : i32, i32
  }
  func.func @transform_1(%arg0: i32) -> (i32, i32) {
    %c0_i32 = arith.constant 0 : i32
    %c0_i32_0 = arith.constant 0 : i32
    %c0_i32_1 = arith.constant 0 : i32
    return %c0_i32, %c0_i32_0 : i32, i32
  }
  func.func @transform_2(%arg0: i32) -> (i32, i32) {
    %c0_i32 = arith.constant 0 : i32
    %c0_i32_0 = arith.constant 0 : i32
    %c0_i32_1 = arith.constant 0 : i32
    return %c0_i32, %c0_i32_0 : i32, i32
  }
  func.func @transform_3(%arg0: i32) -> (i32, i32) {
    %c0_i32 = arith.constant 0 : i32
    %c0_i32_0 = arith.constant 0 : i32
    return %arg0, %c0_i32 : i32, i32
  }
}

</mosaic_0001>

<bundles_post_ra>
// kernel: tpu_custom_call.1
= control target key start
LH: loop header
LB: loop body
LE: loop exit
PB: predicated region body
PF: predicated region fallthrough
CT: control target
= control target key end

     0   :  { %8 = vsyncpa [#allocation3], 0  ;;  %s519_s0 = inlined_call_operand.hbm [shape: bf16[128,128], index: 0, kind: input, shape index: {}]   ;;  %s520_s1 = inlined_call_operand.hbm [shape: bf16[128,128], index: 1, kind: input, shape index: {}]   ;;  %s521_s2 = inlined_call_operand.vmem [shape: f32[1,128], index: 2, kind: input, shape index: {}]   ;;  %s522_s3 = inlined_call_operand.hbm [shape: f32[128,128], index: 3, kind: output, shape index: {}]  }
   0x1   :  { %9 = vsyncpa [#allocation6], 0 }
   0x2   :  { %10 = vsyncpa [#allocation4], 0  ;;  %s480_s12 = smov [#allocation2]  }
   0x3   :  { %s16_s13 = sshll.u32 %s480_s12, 4  ;;  %s17_s13 = int_to_ptr.vmem [resolvable:$true] %s16_s13 }
   0x4   :  { %s422_s14 = scalar_lea.vmem %s17_s13, 1024  ;;  %p427_p1 = scmp.lt.s32.totalorder %s17_s13, %s17_s13 }
   0x5   :  { %p423_p0 = scmp.ne.s32.totalorder %s17_s13, %s422_s14  ;;  %p428_p2 = scmp.lt.s32.totalorder %s422_s14, %s422_s14 }
   0x7   :  { %p429_p3 = por %p428_p2, %p427_p1 }
   0x9   :  { %p430_p4 = pnand %p429_p3, %p423_p0 }
   0xb   :  { %433 = shalt.err (!%p430_p4)
}
   0xc   :  { %s481_s15 = smov 64   ;;  %s482_s16 = smov 4  }
   0xd   :  { %22 = dma.hbm_to_vmem [thread:$0]  %s519_s0, 1024, %s17_s13, [#allocation3], %s481_s15, %s481_s15, %s482_s16  }
   0xe   :  { %s483_s19 = smov [#allocation5]  }
   0xf   :  { %s28_s20 = sshll.u32 %s483_s19, 4  ;;  %s29_s20 = int_to_ptr.vmem [resolvable:$true] %s28_s20 }
  0x10   :  { %s442_s21 = scalar_lea.vmem %s29_s20, 1024  ;;  %p447_p6 = scmp.lt.s32.totalorder %s29_s20, %s29_s20 }
  0x11   :  { %p443_p5 = scmp.ne.s32.totalorder %s29_s20, %s442_s21  ;;  %p448_p7 = scmp.lt.s32.totalorder %s442_s21, %s442_s21 }
  0x13   :  { %p449_p8 = por %p448_p7, %p447_p6 }
  0x15   :  { %p450_p9 = pnand %p449_p8, %p443_p5 }
  0x17   :  { %453 = shalt.err (!%p450_p9)
}
  0x18   :  { %34 = dma.hbm_to_vmem [thread:$0]  %s520_s1, 1024, %s29_s20, [#allocation6], %s481_s15, %s481_s15, %s482_s16  }
  0x19   :  { %474 = dma.done.wait [#allocation3], 1024  }
  0x1a   :  { %475 = vsyncadd [#allocation3], 4294966272 }
  0x1b   :  { %476 = dma.done.wait [#allocation6], 1024  }
  0x1c   :  { %477 = vsyncadd [#allocation6], 4294966272  ;;  %v398_v0 = vld [vmem:[#allocation5 + $0x38] sm:$0xff]   ;;  %v399_v1 = vld [vmem:[#allocation5 + $0x30] sm:$0xff]  }
  0x1d   :  { %343 = vmatprep.subr.bf16.mxu0 %v398_v0  ;;  %375 = vmatprep.subr.bf16.mxu1 %v398_v0  ;;  %v400_v2 = vld [vmem:[#allocation5 + $0x28] sm:$0xff]   ;;  %v401_v3 = vld [vmem:[#allocation5 + $0x20] sm:$0xff]   ;;  %v402_v6 = vld [vmem:[#allocation5 + $0x18] sm:$0xff]  }
  0x1e   :  { %344 = vmatpush3.bf16.msra.mxu0 %v398_v0  ;;  %383 = vmatpush3.bf16.msra.mxu1 %v398_v0  ;;  %v406_v4 = vld [vmem:[#allocation2] sm:$0xff]   ;;  %v403_v7 = vld [vmem:[#allocation5 + $0x10] sm:$0xff]   ;;  %v404_v8 = vld [vmem:[#allocation5 + $0x8] sm:$0xff]  }
  0x1f   :  { %345 = vmatprep.subr.bf16.mxu0 %v399_v1  ;;  %376 = vmatprep.subr.bf16.mxu1 %v399_v1  ;;  %v407_v5 = vld [vmem:[#allocation2 + $0x20] sm:$0xff]   ;;  %v408_v10 = vld [vmem:[#allocation2 + $0x8] sm:$0xff]   ;;  %v410_v12 = vld [vmem:[#allocation2 + $0x10] sm:$0xff]  }
  0x20   :  { %359 = vmatprep.mubr.bf16.mxu0 %v406_v4  ;;  %367 = vmatprep.mubr.bf16.mxu1 %v407_v5  ;;  %v405_v9 = vld [vmem:[#allocation5] sm:$0xff]   ;;  %v409_v11 = vld [vmem:[#allocation2 + $0x28] sm:$0xff]   ;;  %v411_v13 = vld [vmem:[#allocation2 + $0x30] sm:$0xff]  }
  0x21   :  { %v412_v14 = vld [vmem:[#allocation2 + $0x18] sm:$0xff]   ;;  %v310_v16 = vld [vmem:[%s521_s2] ss:$0 sm:$0xff]  ;;  %s484_s2 = smov [#allocation7]  }
  0x22   :  { %346 = vmatpush3.bf16.msra.mxu0 %v399_v1  ;;  %384 = vmatpush3.bf16.msra.mxu1 %v399_v1  ;;  %v413_v15 = vld [vmem:[#allocation2 + $0x38] sm:$0xff]   ;;  %s297_s24 = sshll.u32 %s484_s2, 4  ;;  %s298_s24 = int_to_ptr.vmem [resolvable:$true] %s297_s24 }
  0x23   :  { %347 = vmatprep.subr.bf16.mxu0 %v400_v2  ;;  %377 = vmatprep.subr.bf16.mxu1 %v400_v2  ;;  %s454_s25 = scalar_lea.vmem %s298_s24, 2048  ;;  %p459_p11 = scmp.lt.s32.totalorder %s298_s24, %s298_s24 }
  0x24   :  { %p455_p10 = scmp.ne.s32.totalorder %s298_s24, %s454_s25  ;;  %p460_p12 = scmp.lt.s32.totalorder %s454_s25, %s454_s25 }
  0x26   :  { %348 = vmatpush3.bf16.msra.mxu0 %v400_v2  ;;  %385 = vmatpush3.bf16.msra.mxu1 %v400_v2  ;;  %p461_p13 = por %p460_p12, %p459_p11 }
  0x27   :  { %349 = vmatprep.subr.bf16.mxu0 %v401_v3  ;;  %378 = vmatprep.subr.bf16.mxu1 %v401_v3 }
  0x28   :  { %p462_p0 = pnand %p461_p13, %p455_p10 }
  0x2a   :  { %350 = vmatpush3.bf16.msra.mxu0 %v401_v3  ;;  %386 = vmatpush3.bf16.msra.mxu1 %v401_v3 }
  0x2b   :  { %351 = vmatprep.subr.bf16.mxu0 %v402_v6  ;;  %379 = vmatprep.subr.bf16.mxu1 %v402_v6 }
  0x2e   :  { %352 = vmatpush3.bf16.msra.mxu0 %v402_v6  ;;  %387 = vmatpush3.bf16.msra.mxu1 %v402_v6 }
  0x2f   :  { %353 = vmatprep.subr.bf16.mxu0 %v403_v7  ;;  %380 = vmatprep.subr.bf16.mxu1 %v403_v7 }
  0x32   :  { %354 = vmatpush3.bf16.msra.mxu0 %v403_v7  ;;  %388 = vmatpush3.bf16.msra.mxu1 %v403_v7 }
  0x33   :  { %355 = vmatprep.subr.bf16.mxu0 %v404_v8  ;;  %381 = vmatprep.subr.bf16.mxu1 %v404_v8 }
  0x36   :  { %356 = vmatpush3.bf16.msra.mxu0 %v404_v8  ;;  %389 = vmatpush3.bf16.msra.mxu1 %v404_v8 }
  0x37   :  { %357 = vmatprep.subr.bf16.mxu0 %v405_v9  ;;  %382 = vmatprep.subr.bf16.mxu1 %v405_v9 }
  0x3a   :  { %358 = vmatpush3.bf16.msra.mxu0 %v405_v9  ;;  %390 = vmatpush3.bf16.msra.mxu1 %v405_v9 }
  0x3d   :  { %360 = vmatmul.mubr.bf16.vlgmr.msra.gmra.mxu0 %v408_v10  ;;  %368 = vmatmul.mubr.bf16.vlgmr.msra.gmra.mxu1 %v409_v11 }
  0x3e   :  { %363 = vmatprep.mubr.bf16.mxu0 %v410_v12  ;;  %371 = vmatprep.mubr.bf16.mxu1 %v411_v13 }
  0x45   :  { %364 = vmatmul.mubr.bf16.gmra.mxu0 %v412_v14  ;;  %372 = vmatmul.mubr.bf16.gmra.mxu1 %v413_v15 }
  0xfd   :  { %v361_v17 = vpop.f32.mrf.mxu0  ;;  %v369_v18 = vpop.f32.mrf.mxu1 }
  0xfe   :  { %v222_v19 = vadd.f32 %v361_v17, %v310_v16  ;;  %v254_v20 = vadd.f32 %v369_v18, %v310_v16 }
  0xff   :  { %v213_v21 = vpop.f32.mrf.mxu0  ;;  %v245_v22 = vpop.f32.mrf.mxu1 }
 0x100   :  { %278 = vst [vmem:[#allocation7 + $0x10] sm:$0xff] %v222_v19  ;;  %286 = vst [vmem:[#allocation7 + $0x50] sm:$0xff] %v254_v20  ;;  %v214_v23 = vadd.f32 %v310_v16, %v213_v21  ;;  %v246_v24 = vadd.f32 %v310_v16, %v245_v22 }
 0x101   :  { %v362_v25 = vpop.f32.mrf.mxu0  ;;  %v370_v26 = vpop.f32.mrf.mxu1 }
 0x102   :  { %276 = vst [vmem:[#allocation7] sm:$0xff] %v214_v23  ;;  %284 = vst [vmem:[#allocation7 + $0x40] sm:$0xff] %v246_v24  ;;  %v225_v27 = vadd.f32 %v362_v25, %v310_v16  ;;  %v257_v28 = vadd.f32 %v370_v26, %v310_v16 }
 0x103   :  { %v216_v29 = vpop.f32.mrf.mxu0  ;;  %v248_v30 = vpop.f32.mrf.mxu1 }
 0x104   :  { %279 = vst [vmem:[#allocation7 + $0x18] sm:$0xff] %v225_v27  ;;  %287 = vst [vmem:[#allocation7 + $0x58] sm:$0xff] %v257_v28  ;;  %v217_v31 = vadd.f32 %v310_v16, %v216_v29  ;;  %v249_v32 = vadd.f32 %v310_v16, %v248_v30 }
 0x105   :  { %v365_v33 = vpop.f32.mrf.mxu0  ;;  %v373_v34 = vpop.f32.mrf.mxu1 }
 0x106   :  { %277 = vst [vmem:[#allocation7 + $0x8] sm:$0xff] %v217_v31  ;;  %285 = vst [vmem:[#allocation7 + $0x48] sm:$0xff] %v249_v32  ;;  %v238_v35 = vadd.f32 %v365_v33, %v310_v16  ;;  %v270_v36 = vadd.f32 %v373_v34, %v310_v16 }
 0x107   :  { %v229_v37 = vpop.f32.mrf.mxu0  ;;  %v261_v38 = vpop.f32.mrf.mxu1 }
 0x108   :  { %282 = vst [vmem:[#allocation7 + $0x30] sm:$0xff] %v238_v35  ;;  %290 = vst [vmem:[#allocation7 + $0x70] sm:$0xff] %v270_v36  ;;  %v230_v39 = vadd.f32 %v310_v16, %v229_v37  ;;  %v262_v40 = vadd.f32 %v310_v16, %v261_v38 }
 0x109   :  { %v366_v41 = vpop.f32.mrf.mxu0  ;;  %v374_v42 = vpop.f32.mrf.mxu1 }
 0x10a   :  { %280 = vst [vmem:[#allocation7 + $0x20] sm:$0xff] %v230_v39  ;;  %288 = vst [vmem:[#allocation7 + $0x60] sm:$0xff] %v262_v40  ;;  %v241_v43 = vadd.f32 %v366_v41, %v310_v16  ;;  %v273_v44 = vadd.f32 %v374_v42, %v310_v16 }
 0x10b   :  { %v232_v45 = vpop.f32.mrf.mxu0  ;;  %v264_v46 = vpop.f32.mrf.mxu1 }
 0x10c   :  { %283 = vst [vmem:[#allocation7 + $0x38] sm:$0xff] %v241_v43  ;;  %291 = vst [vmem:[#allocation7 + $0x78] sm:$0xff] %v273_v44  ;;  %v233_v47 = vadd.f32 %v310_v16, %v232_v45  ;;  %v265_v48 = vadd.f32 %v310_v16, %v264_v46 }
 0x10e   :  { %281 = vst [vmem:[#allocation7 + $0x28] sm:$0xff] %v233_v47  ;;  %289 = vst [vmem:[#allocation7 + $0x68] sm:$0xff] %v265_v48 }
 0x10f   :  { %465 = shalt.err (!%p462_p0)
}
 0x110   :  { %s485_s26 = smov 128   ;;  %s486_s27 = smov 8  }
 0x111   :  { %303 = dma.vmem_to_hbm [thread:$0]  %s298_s24, 2048, %s522_s3, [#allocation4], %s485_s26, %s485_s26, %s486_s27  }
 0x112   :  { %478 = dma.done.wait [#allocation4], 2048  }
 0x113   :  { %479 = vsyncadd [#allocation4], 4294965248 }
 0x114   :  { %307 = vsyncpa [#allocation3], 1 }
 0x115   :  { %308 = vsyncpa [#allocation6], 1 }
 0x116   :  { %309 = vsyncpa [#allocation4], 1 }

</bundles_post_ra>
